<compile_context>
chip_gen: v5e
topology: v5e:2x2
jax: 0.10.0
libtpu: 0.0.40
codegen_flags: <defaults>
</compile_context>

<pallas_src>
import jax
import jax.numpy as jnp
import numpy as np
from jax.experimental import pallas as pl
from jax.experimental.pallas import tpu as pltpu

_TARGET_TILE_BYTES = 4 * 1024 * 1024   # per input buffer (double-buffered by Pallas)
_MAX_ROW_TILE = 2048
_LANE_CANDIDATES = (1024, 512, 256, 128)


def _round_up(x, m):
    return ((x + m - 1) // m) * m


def _temp_scale_kernel(t_ref, x_ref, o_ref):
    # t_ref: (1,) f32 scalar in SMEM; x_ref / o_ref: [tm, cols] VMEM tiles.
    inv_t = 1.0 / t_ref[0]                      # scalar-path reciprocal, hoisted
    x = x_ref[...].astype(jnp.float32)
    o_ref[...] = (x * inv_t).astype(o_ref.dtype)


def _pick_2d_view(shape):
    """Pick a copy-free 2D (rows, cols) view of a contiguous array."""
    n = 1
    for d in shape:
        n *= d
    # Prefer a lane-dense view (cols a multiple of 128 -> unmasked stores). A
    # reshape of a contiguous row-major array is free: no pad, no HBM copy.
    for lane in _LANE_CANDIDATES:
        if n % lane == 0:
            return n // lane, lane
    cols = shape[-1] if len(shape) >= 1 else 1
    cols = max(int(cols), 1)
    return n // cols, cols


def _pick_row_tile(rows, cols, itemsize):
    if rows <= 8:
        return rows                              # full second-minor dim: legal
    tm = _TARGET_TILE_BYTES // max(1, cols * itemsize)
    tm = max(8, min(_MAX_ROW_TILE, (tm // 8) * 8))
    # Keep >=2 grid steps so both v7x TensorCores get work and the DMA
    # double-buffering has something to overlap with.
    half = _round_up(pl.cdiv(rows, 2), 8)
    return max(8, min(tm, half))


def temperature_scale(logits, temperature):
    """logits / temperature (PyTorch TemperatureScaling.forward)."""
    orig_shape = logits.shape
    t = jnp.asarray(temperature, jnp.float32).reshape((1,))
    out_dtype = jnp.promote_types(logits.dtype, jnp.float32)  # torch promotion

    n = int(logits.size)
    if n == 0:
        return logits.astype(out_dtype)

    rows, cols = _pick_2d_view(orig_shape)
    x2d = logits.reshape(rows, cols)             # free reshape, no pad / copy
    tm = _pick_row_tile(rows, cols, x2d.dtype.itemsize)
    grid = (pl.cdiv(rows, tm),)                  # partial last block is masked

    cost = pl.CostEstimate(
        flops=n,
        transcendentals=0,
        bytes_accessed=n * (x2d.dtype.itemsize + jnp.dtype(out_dtype).itemsize),
    )

    out = pl.pallas_call(
        _temp_scale_kernel,
        out_shape=jax.ShapeDtypeStruct((rows, cols), out_dtype),
        grid_spec=pl.GridSpec(
            grid=grid,
            in_specs=[
                # scalar temperature: whole (1,) array resident in SMEM
                pl.BlockSpec(memory_space=pltpu.MemorySpace.SMEM),
                pl.BlockSpec((tm, cols), lambda i: (i, 0)),
            ],
            out_specs=pl.BlockSpec((tm, cols), lambda i: (i, 0)),
        ),
        compiler_params=pltpu.CompilerParams(
            dimension_semantics=("parallel",),       # dual-TC sharding on v7x
            vmem_limit_bytes=48 * 1024 * 1024,       # > v5e's 16 MiB default, < v7x's 64 MiB
        ),
        cost_estimate=cost,
    )(t, x2d)

    return out.reshape(orig_shape)


if __name__ == "__main__":
    key = jax.random.PRNGKey(0)
    k1, k2 = jax.random.split(key)

    # nn.Parameter(torch.ones(1) * init_temp) with init_temp = 1.5
    init_temp = 1.5
    temperature = jnp.full((1,), init_temp, jnp.float32)

    # Classification-head logits: [batch, num_classes].
    # 128*100 = 12800 -> lane-dense (25, 512) view, tm=16, 2-step parallel grid
    # with a masked partial last block.
    logits = jax.random.normal(k1, (128, 100), jnp.float32) * 3.0
    out = jax.block_until_ready(temperature_scale(logits, temperature))
    ref = logits / temperature[0]
    np.testing.assert_allclose(np.asarray(out), np.asarray(ref),
                               rtol=1e-5, atol=1e-6)

    # Odd-shaped input exercising the full-dim (non lane-aligned) block path.
    logits2 = jax.random.normal(k2, (2, 3, 7), jnp.float32)
    out2 = jax.block_until_ready(temperature_scale(logits2, temperature))
    ref2 = logits2 / temperature[0]
    np.testing.assert_allclose(np.asarray(out2), np.asarray(ref2),
                               rtol=1e-5, atol=1e-6)

    print("KERNEL_OK")
</pallas_src>

<mosaic_0001>
module attributes {stable_mosaic.version = 11 : i64} {
  func.func @_temp_scale_kernel(%arg0: i32, %arg1: memref<1xf32, #tpu.memory_space<smem>>, %arg2: memref<16x512xf32, #tpu.memory_space<vmem>>, %arg3: memref<16x512xf32, #tpu.memory_space<vmem>>) attributes {dimension_semantics = [#tpu.dimension_semantics<parallel>], iteration_bounds = array<i64: 2>, scalar_prefetch = 0 : i64, scratch_operands = 0 : i64, tpu.core_type = #tpu.core_type<tc>, window_params = [{transform_indices = @transform_0, window_bounds = array<i64: 1>}, {transform_indices = @transform_1, window_bounds = array<i64: 16, 512>}, {transform_indices = @transform_2, window_bounds = array<i64: 16, 512>}]} {
    %c0 = arith.constant 0 : index
    %0 = memref.load %arg1[%c0] : memref<1xf32, #tpu.memory_space<smem>>
    %cst = arith.constant 1.000000e+00 : f32
    %1 = arith.divf %cst, %0 : f32
    %c0_0 = arith.constant 0 : index
    %c0_1 = arith.constant 0 : index
    %2 = vector.load %arg2[%c0_0, %c0_1] : memref<16x512xf32, #tpu.memory_space<vmem>>, vector<16x512xf32>
    %3 = vector.broadcast %1 : f32 to vector<16x512xf32>
    %4 = arith.mulf %2, %3 : vector<16x512xf32>
    %c0_2 = arith.constant 0 : index
    %c0_3 = arith.constant 0 : index
    %5 = vector.load %arg3[%c0_2, %c0_3] : memref<16x512xf32, #tpu.memory_space<vmem>>, vector<16x512xf32>
    tpu.vector_store %arg3[%c0_2, %c0_3], %4 {strides = array<i32>} : memref<16x512xf32, #tpu.memory_space<vmem>>, vector<16x512xf32>,
    return
  }
  func.func @transform_0(%arg0: i32) -> i32 {
    %c0_i32 = arith.constant 0 : i32
    %c0_i32_0 = arith.constant 0 : i32
    return %c0_i32 : i32
  }
  func.func @transform_1(%arg0: i32) -> (i32, i32) {
    %c0_i32 = arith.constant 0 : i32
    %c0_i32_0 = arith.constant 0 : i32
    return %arg0, %c0_i32 : i32, i32
  }
  func.func @transform_2(%arg0: i32) -> (i32, i32) {
    %c0_i32 = arith.constant 0 : i32
    %c0_i32_0 = arith.constant 0 : i32
    return %arg0, %c0_i32 : i32, i32
  }
}

</mosaic_0001>

<bundles_post_ra>
// kernel: tpu_custom_call.1
= control target key start
LH: loop header
LB: loop body
LE: loop exit
PB: predicated region body
PF: predicated region fallthrough
CT: control target
= control target key end

     0   :  { %s635_s0 = inlined_call_operand.<no memory space> [shape: f32[1], index: 0, kind: input, shape index: {}]   ;;  %s636_s1 = inlined_call_operand.hbm [shape: f32[25,512], index: 1, kind: input, shape index: {}]   ;;  %s637_s2 = inlined_call_operand.hbm [shape: f32[25,512], index: 2, kind: output, shape index: {}]  }
   0x1   :  { %7 = sst [smem:[#allocation2]] %s635_s0 }
   0x2   :  { %8 = vsyncpa [#allocation4], 0 }
   0x3   :  { %10 = vsyncpa [#allocation4 + $0x1], 0 }
   0x4   :  { %11 = vsyncpa [#allocation5], 0 }
   0x5   :  { %13 = vsyncpa [#allocation5 + $0x1], 0  ;;  %s494_s11 = smov 0   ;;  %s496_s12 = smov 0  }
   0x6   :  { %s498_s13 = smov 0   ;;  %s500_s14 = smov 0  }
   0x7 LB: > { %s515_s0 = sadd.s32 4294967295, %s470_s14   ;;  %s300_s15 = sadd.s32 4294967294, %s470_s14   ;;  %s470_s14 = sphi %s500_s14, %s647_s14   ;;  %s466_s13 = sphi %s498_s13, %s646_s13   ;;  %s462_s12 = sphi %s496_s12, %s645_s12   ;;  %s458_s11 = sphi %s494_s11, %s644_s11  }
   0x8   : > { %s519_s16 = sadd.s32 1, %s470_s14   ;;  %s47_s17 = sadd.s32 1, %s466_s13 }
   0x9   : > { %s44_s18 = ssub.s32 %s470_s14, %s519_s16  ;;  %p54_p0 = scmp.ne.s32.totalorder %s466_s13, %s462_s12 }
   0xa   : > { %p45_p1 = scmp.eq.s32.totalorder %s44_s18, 0  ;;  %p55_p2 = scmp.eq.s32.totalorder %s470_s14, 0 }
   0xb   : > { %p60_p3 = scmp.ne.s32.totalorder %s462_s12, %s458_s11  ;;  %p61_p4 = scmp.eq.s32.totalorder %s515_s0, 0 }
   0xc   : > { %s531_s19 = scalar_select %p45_p1, %s466_s13, %s47_s17  }
   0xd   : > { %p533_p5 = por %p55_p2, %p54_p0  ;;  %p537_p6 = por %p61_p4, %p60_p3 }
   0xe   : > { %p84_p7 = scmp.eq.s32.totalorder %s515_s0, 1  ;;  %p90_p8 = scmp.eq.s32.totalorder %s300_s15, 1 }
   0xf   : > { %p334_p10 = scmp.lt.s32.totalorder %s470_s14, 2  ;;  %s113_s24 = sand.u32 1, %s466_s13  }
  0x10   : > { %p544_p11 = por %p84_p7, %p54_p0  ;;  %p548_p12 = por %p90_p8, %p60_p3 }
  0x11   : > { %s317_s25 = sshll.u32 %s470_s14, 6  ;;  %s303_s26 = sshll.u32 %s113_s24, 6 }
  0x12   : > { %s123_s29 = scalar_lea.hbm %s636_s1, %s317_s25  ;;  %s117_s3 = scalar_lea.vmem [#allocation3], %s303_s26 }
  0x13   : > { %s124_s30 = sshll.u32 %s123_s29, 4  ;;  %s126_s4 = sshll.u32 %s117_s3, 4  ;;  %s125_s30 = int_to_ptr.hbm [resolvable:$true] %s124_s30  ;;  %s127_s4 = int_to_ptr.vmem [resolvable:$true] %s126_s4 }
  0x14   : > { %p559_p13 = pnand %p334_p10, %p533_p5  ;;  %p307_p0 = scmp.ge.s32.totalorder %s470_s14, 1 }
  0x15   : > { %p134_p1 = scmp.lt.s32.totalorder %s470_s14, 3  ;;  %s114_s6 = scalar_lea.sflag [#allocation4], %s113_s24 }
  0x16   : > { %s374_s7 = sshra.s32 %s125_s30, 4  ;;  %p378_p3 = pneg %p559_p13  ;;  %s375_s7 = int_to_ptr.hbm [resolvable:$true] %s374_s7 }
  0x17   : > { %s376_s8 = scalar_lea.hbm %s375_s7, 64  ;;  %s381_s15 = scalar_lea.hbm %s636_s1, 128 }
  0x18   : > { %p377_p2 = scmp.ne.s32.totalorder %s375_s7, %s376_s8  ;;  %p382_p5 = scmp.lt.s32.totalorder %s375_s7, %s636_s1 }
  0x19   : > { %p383_p8 = scmp.lt.s32.totalorder %s381_s15, %s376_s8 }
  0x1a   : > { %p379_p4 = pnand %p378_p3, %p377_p2 }
  0x1b   : > { %p384_p10 = por %p383_p8, %p382_p5 }
  0x1c   : > { %p380_p7 = pneg %p379_p4 }
  0x1e   : > { %p385_p9 = pnand %p384_p10, %p380_p7 }
  0x20   : > { %388 = shalt.err (!%p385_p9)
}
  0x21   : > { %s472_s20 = smov 512   ;;  %s473_s24 = smov 32  }
  0x22   : > { %329 = dma.hbm_to_vmem [thread:$0]  (!%p559_p13), %s125_s30, 1024, %s127_s4, %s114_s6, %s472_s20, %s472_s20, %s473_s24  }
  0x23   : > { %p135_p2 = pnand %p307_p0, %p134_p1 }
  0x24   : > { %s580_s25 = sand.u32 (!%p135_p2), 1, %s462_s12  }
  0x25   : > { %138 = sbr.rel (%p135_p2) target bundleno = 131 (0x83), region = 28  ;;  %s308_s26 = sshll.u32 (!%p135_p2), %s580_s25, 6 }
  0x26   : > { %s141_s27 = scalar_lea.sflag (!%p135_p2), [#allocation4], %s580_s25  ;;  %s586_s28 = scalar_lea.vmem (!%p135_p2), [#allocation3], %s308_s26 }
  0x2a   : > { %449 = dma.done.wait (%p537_p6), %s141_s27, 1024  }
  0x2b   : > { %451 = vsyncadd (%p537_p6), %s141_s27, 4294966272  ;;  %s168_s29 = sld [smem:[#allocation2]]  ;;  %v185_v11 = vld [vmem:[%s586_s28] sm:$0xff]  ;;  %v186_v12 = vld [vmem:[%s586_s28 + $0x8] sm:$0xff]  ;;  %s319_s21 = sshll.u32 %s515_s0, 6 }
  0x2c   : > { %v187_v13 = vld [vmem:[%s586_s28 + $0x10] sm:$0xff]  ;;  %v188_v14 = vld [vmem:[%s586_s28 + $0x18] sm:$0xff]  ;;  %v189_v15 = vld [vmem:[%s586_s28 + $0x20] sm:$0xff]  ;;  %s223_s5 = scalar_lea.hbm %s637_s2, %s319_s21  ;;  %s165_s6 = scalar_lea.vmem [#allocation6], %s308_s26 }
  0x2d   : > { %v190_v17 = vld [vmem:[%s586_s28 + $0x28] sm:$0xff]  ;;  %v191_v21 = vld [vmem:[%s586_s28 + $0x30] sm:$0xff]  ;;  %v192_v23 = vld [vmem:[%s586_s28 + $0x38] sm:$0xff]  ;;  %s224_s0 = sshll.u32 %s165_s6, 4  ;;  %s226_s7 = sshll.u32 %s223_s5, 4  ;;  %s225_s0 = int_to_ptr.vmem [resolvable:$true] %s224_s0  ;;  %s227_s7 = int_to_ptr.hbm [resolvable:$true] %s226_s7 }
  0x2e   : > { %s211_s8 = scalar_lea.sflag [#allocation5], %s580_s25  ;;  %s418_s9 = sshra.s32 %s227_s7, 4  ;;  %s419_s9 = int_to_ptr.hbm [resolvable:$true] %s418_s9 }
  0x2f   : > { %s420_s10 = scalar_lea.hbm %s419_s9, 64  ;;  %s424_s18 = scalar_lea.hbm %s637_s2, 128 }
  0x30   : > { %p421_p6 = scmp.ne.s32.totalorder %s419_s9, %s420_s10  ;;  %p425_p0 = scmp.lt.s32.totalorder %s419_s9, %s637_s2 }
  0x31   : > { %v169_v0 = vstv %s168_s29  ;;  %p426_p1 = scmp.lt.s32.totalorder %s424_s18, %s420_s10 }
  0x32   : > { %372 = vrcp.f32 %v169_v0  ;;  %v181_v3 = vand.u32 2147483648, %v169_v0  ;;  %vm175_vm0 = vweird.f32 %v169_v0  ;;  %v179_v5 = vand.u32 2147483647, %v169_v0  ;;  %p422_p9 = pnand %p421_p6, %p544_p11 }
  0x33   : > { %p427_p3 = por %p426_p1, %p425_p0 }
  0x34   : > { %v182_v7 = vor.u32 1.1754944e-38, %v181_v3  ;;  %vm180_vm3 = vcmp.eq.f32.partialorder %v179_v5, 8.507059e+37  ;;  %p423_p13 = pneg %p422_p9 }
  0x36   : > { %p428_p4 = pnand %p427_p3, %p423_p13 }
  0x38   : > { %v373_v1 = vpop.eup %372 }
  0x39   : > { %v171_v2 = vmul.f32 %v373_v1, %v169_v0  ;;  %vm176_vm1 = vweird.f32 %v373_v1 }
  0x3a   : > { %vm177_vm2 = vmor %vm175_vm0, %vm176_vm1 }
  0x3b   : > { %v172_v4 = vsub.f32 1.0, %v171_v2 }
  0x3d   : > { %v173_v6 = vmul.f32 %v373_v1, %v172_v4 }
  0x3f   : > { %v174_v8 = vadd.f32 %v373_v1, %v173_v6 }
  0x41   : > { %v178_v9 = vsel %vm177_vm2, %v373_v1, %v174_v8 }
  0x42   : > { %v183_v10 = vsel %vm180_vm3, %v182_v7, %v178_v9 }
  0x43   : > { %320 = vpush %v183_v10 }
  0x74   : > { %s321_s30 = spop %320 }
  0x75   : > { %v193_v16 = vstv %s321_s30 }
  0x76   : > { %v194_v18 = vmul.f32 %v193_v16, %v185_v11  ;;  %v195_v19 = vmul.f32 %v193_v16, %v186_v12  ;;  %v196_v20 = vmul.f32 %v193_v16, %v187_v13  ;;  %v197_v22 = vmul.f32 %v193_v16, %v188_v14 }
  0x77   : > { %v198_v24 = vmul.f32 %v193_v16, %v189_v15  ;;  %v199_v25 = vmul.f32 %v193_v16, %v190_v17  ;;  %v200_v26 = vmul.f32 %v193_v16, %v191_v21  ;;  %v201_v27 = vmul.f32 %v193_v16, %v192_v23 }
  0x78   : > { %202 = vst [vmem:[%s165_s6] sm:$0xff] %v194_v18 }
  0x79   : > { %203 = vst [vmem:[%s165_s6 + $0x8] sm:$0xff] %v195_v19 }
  0x7a   : > { %204 = vst [vmem:[%s165_s6 + $0x10] sm:$0xff] %v196_v20 }
  0x7b   : > { %205 = vst [vmem:[%s165_s6 + $0x18] sm:$0xff] %v197_v22 }
  0x7c   : > { %206 = vst [vmem:[%s165_s6 + $0x20] sm:$0xff] %v198_v24 }
  0x7d   : > { %207 = vst [vmem:[%s165_s6 + $0x28] sm:$0xff] %v199_v25 }
  0x7e   : > { %208 = vst [vmem:[%s165_s6 + $0x30] sm:$0xff] %v200_v26 }
  0x7f   : > { %209 = vst [vmem:[%s165_s6 + $0x38] sm:$0xff] %v201_v27 }
  0x80   : > { %431 = shalt.err (!%p428_p4)
}
  0x81   : > { %s474_s25 = smov 512   ;;  %s475_s26 = smov 32  }
  0x82   : > { %324 = dma.vmem_to_hbm [thread:$0]  (%p544_p11), %s225_s0, 1024, %s227_s7, %s211_s8, %s474_s25, %s474_s25, %s475_s26  }
  0x83 PF: > { %s241_s27 = sand.u32 1, %s458_s11   ;;  %p643_p7 = scmp.ge.s32.totalorder %s470_s14, 2 }
  0x84   : > { %s242_s28 = scalar_lea.sflag [#allocation5], %s241_s27 }
  0x85   : > { %p331_p5 = pnand %p643_p7, %p548_p12 }
  0x87   : > { %p332_p8 = pneg %p331_p5 }
  0x89   : > { %453 = dma.done.wait (%p332_p8), %s242_s28, 1024  }
  0x8a   : > { %455 = vsyncadd (%p332_p8), %s242_s28, 4294966272  ;;  %p16_p10 = scmp.ge.s32.totalorder %s519_s16, 4   ;;  %s644_s11 = smov %s462_s12 }
  0x8b   : > { %s645_s12 = smov %s466_s13  ;;  %s646_s13 = smov %s531_s19 }
  0x8c   : > { %s647_s14 = smov %s519_s16  ;;  %18 = sbr.rel (!%p16_p10) target bundleno = 7 (0x7), region = 73 }
  0x91   :  { %248 = vsyncpa [#allocation4], 1 }
  0x92   :  { %250 = vsyncpa [#allocation4 + $0x1], 1 }
  0x93   :  { %251 = vsyncpa [#allocation5], 1 }
  0x94   :  { %253 = vsyncpa [#allocation5 + $0x1], 1 }

</bundles_post_ra>
